<compile_context>
chip_gen: v7x
topology: tpu7x:2x2x1
jax: 0.10.0
libtpu: 0.0.40
codegen_flags: <defaults>
</compile_context>

<pallas_src>
import functools

import jax
import jax.numpy as jnp
from jax.experimental import pallas as pl
from jax.experimental.pallas import tpu as pltpu

_NEG_INF = -1e30   # bias for padded class lanes -> exp underflows to 0 in softmax
_LANE = 128
_SUBLANE = 8


def _round_up(x, m):
    return ((x + m - 1) // m) * m


# ----------------------------------------------------------------------------
# Pallas kernel: logits = bf16(X) @ bf16(W) (f32 accumulate) + b, then a
# numerically-stable row softmax over the (lane-padded) class dimension.
# ----------------------------------------------------------------------------
def logistic_kernel(x_ref, w_ref, b_ref, o_ref):
    # Cast activations to bf16 in-kernel (VPU work hidden under the x DMA);
    # weights already arrive bf16. MXU accumulates in f32.
    x = x_ref[...].astype(jnp.bfloat16)
    z = jnp.dot(x, w_ref[...], preferred_element_type=jnp.float32)
    z = z + b_ref[...]                       # padded class lanes carry -1e30 bias
    m = jnp.max(z, axis=-1, keepdims=True)   # real lanes dominate the max
    e = jnp.exp(z - m)                       # padded lanes -> exp(-huge) = 0
    s = jnp.sum(e, axis=-1, keepdims=True)
    # EUP reciprocal + VPU multiply instead of a per-element divide.
    o_ref[...] = (e * pl.reciprocal(s, approx=True)).astype(o_ref.dtype)


def _pick_block_b(batch):
    """Batch-tile heuristic.

    * tiny batch  -> one minimal 8-row-aligned tile (no 128x padding waste)
    * medium/large -> <=512-row tiles, at least 2 tiles so a 2-TC chip can
      shard the "parallel" batch axis and the 256-wide MXU is filled.
    """
    b8 = _round_up(max(batch, 1), _SUBLANE)
    if b8 <= 64:
        return b8
    if b8 <= 1024:
        return min(512, _round_up((b8 + 1) // 2, _SUBLANE))
    return 512


# ----------------------------------------------------------------------------
# Wrapper: flatten (free view) + minimal last-tile batch padding; all compute
# is in-kernel. Params arrive kernel-ready: w_pad (F, NP) pre-transposed,
# lane-padded, bf16; b_pad (1, NP) f32 with -1e30 in the padded class lanes.
# ----------------------------------------------------------------------------
@functools.partial(jax.jit, static_argnames=("n_classes", "block_b"))
def logistic_forward(x_nchw, w_pad, b_pad, *, n_classes=10, block_b=None):
    B = x_nchw.shape[0]
    # nn.Flatten(): (B, C, H, W) -> (B, C*H*W), row-major (matches PyTorch).
    # No dtype cast here -- that would be an extra HBM pass over x.
    x = x_nchw.reshape(B, -1)
    F_dim = x.shape[1]
    NP = w_pad.shape[1]

    if block_b is None:
        block_b = _pick_block_b(B)

    # Pad only the slack rows of the last batch tile (sublane alignment).
    B_pad = _round_up(max(B, 1), block_b)
    if B_pad != B:
        x = jnp.pad(x, ((0, B_pad - B), (0, 0)))

    grid = (B_pad // block_b,)
    x_bytes = jnp.dtype(x.dtype).itemsize
    cost = pl.CostEstimate(
        flops=2 * B_pad * F_dim * NP,
        transcendentals=B_pad * NP,
        bytes_accessed=(x_bytes * B_pad * F_dim      # activations (native dtype)
                        + 2 * F_dim * NP             # bf16 weights
                        + 4 * NP                     # f32 bias
                        + 4 * B_pad * NP),           # f32 probabilities out
    )

    out = pl.pallas_call(
        logistic_kernel,
        out_shape=jax.ShapeDtypeStruct((B_pad, NP), jnp.float32),
        grid_spec=pltpu.PrefetchScalarGridSpec(
            num_scalar_prefetch=0,
            grid=grid,
            in_specs=[
                pl.BlockSpec((block_b, F_dim), lambda i: (i, 0)),  # x tile (pipelined)
                pl.BlockSpec((F_dim, NP), lambda i: (0, 0)),       # W (VMEM-resident)
                pl.BlockSpec((1, NP), lambda i: (0, 0)),           # b (VMEM-resident)
            ],
            out_specs=pl.BlockSpec((block_b, NP), lambda i: (i, 0)),
        ),
        compiler_params=pltpu.CompilerParams(
            dimension_semantics=("parallel",),
            vmem_limit_bytes=32 * 1024 * 1024,
        ),
        cost_estimate=cost,
    )(x, w_pad, b_pad)

    return out[:B, :n_classes]


# ----------------------------------------------------------------------------
# Deterministic parameter init mirroring the PyTorch module:
#   weight: xavier_uniform_; bias: default nn.Linear init U(-1/sqrt(fan_in), +).
# Emits kernel-ready (pre-transposed, lane-padded, bf16) params plus the plain
# f32 (in, out) / (out,) pair for the pure-JAX reference.
# ----------------------------------------------------------------------------
def init_logistic_params(key, flatten_size, n_classes=10, lane_pad=_LANE):
    NP = _round_up(n_classes, lane_pad)
    kw, kb = jax.random.split(key)
    bound_w = (6.0 / (flatten_size + n_classes)) ** 0.5        # xavier_uniform_
    w_t = jax.random.uniform(kw, (flatten_size, n_classes), jnp.float32,
                             -bound_w, bound_w)                # stored (in, out)
    bound_b = 1.0 / (flatten_size ** 0.5)                      # default bias init
    b = jax.random.uniform(kb, (n_classes,), jnp.float32, -bound_b, bound_b)

    w_pad = (jnp.zeros((flatten_size, NP), jnp.float32)
             .at[:, :n_classes].set(w_t)
             .astype(jnp.bfloat16))                            # bf16 MXU operand
    b_pad = jnp.full((1, NP), _NEG_INF, jnp.float32).at[0, :n_classes].set(b)
    return w_pad, b_pad, w_t, b


# ----------------------------------------------------------------------------
# Pure-JAX f32 reference for a correctness sanity check.
# ----------------------------------------------------------------------------
def logistic_reference(x_nchw, w_t, b):
    x = x_nchw.reshape(x_nchw.shape[0], -1).astype(jnp.float32)
    z = x @ w_t + b
    return jax.nn.softmax(z, axis=1)


if __name__ == "__main__":
    # Module defaults: input_size=(32, 32), in_channels=3, n_classes=10.
    B, C, H, W = 2, 3, 32, 32
    n_classes = 10
    flatten_size = C * H * W  # 3072

    key = jax.random.PRNGKey(0)
    key, kx = jax.random.split(key)
    x = jax.random.normal(kx, (B, C, H, W), jnp.float32)
    w_pad, b_pad, w_t, b = init_logistic_params(key, flatten_size, n_classes)

    y = logistic_forward(x, w_pad, b_pad, n_classes=n_classes)
    y = jax.block_until_ready(y)

    y_ref = logistic_reference(x, w_t, b)
    assert y.shape == (B, n_classes), y.shape
    # bf16 matmul + approx reciprocal -> loosened tolerance vs the f32 reference.
    assert jnp.allclose(y, y_ref, atol=2e-2, rtol=2e-2), "mismatch vs reference"
    assert jnp.allclose(jnp.sum(y, axis=1), 1.0, atol=1e-2), "softmax rows != 1"

    print("KERNEL_OK")
</pallas_src>

<mosaic_0001>
module attributes {stable_mosaic.version = 11 : i64} {
  func.func @logistic_kernel(%arg0: i32, %arg1: memref<8x3072xf32, #tpu.memory_space<vmem>>, %arg2: memref<3072x128xbf16, #tpu.memory_space<vmem>>, %arg3: memref<1x128xf32, #tpu.memory_space<vmem>>, %arg4: memref<8x128xf32, #tpu.memory_space<vmem>>) attributes {dimension_semantics = [#tpu.dimension_semantics<parallel>], iteration_bounds = array<i64: 1>, scalar_prefetch = 0 : i64, scratch_operands = 0 : i64, tpu.core_type = #tpu.core_type<tc>, window_params = [{transform_indices = @transform_0, window_bounds = array<i64: 8, 3072>}, {pipeline_mode = #tpu.pipeline_mode<synchronous>, transform_indices = @transform_1, window_bounds = array<i64: 3072, 128>}, {pipeline_mode = #tpu.pipeline_mode<synchronous>, transform_indices = @transform_2, window_bounds = array<i64: 1, 128>}, {transform_indices = @transform_3, window_bounds = array<i64: 8, 128>}]} {
    %c0 = arith.constant 0 : index
    %c0_0 = arith.constant 0 : index
    %0 = vector.load %arg1[%c0, %c0_0] : memref<8x3072xf32, #tpu.memory_space<vmem>>, vector<8x3072xf32>
    %1 = arith.truncf %0 : vector<8x3072xf32> to vector<8x3072xbf16>
    %c0_1 = arith.constant 0 : index
    %c0_2 = arith.constant 0 : index
    %2 = vector.load %arg2[%c0_1, %c0_2] : memref<3072x128xbf16, #tpu.memory_space<vmem>>, vector<3072x128xbf16>
    %cst = arith.constant dense<0.000000e+00> : vector<8x128xf32>
    %3 = tpu.matmul %1, %2, %cst {dimension_numbers = #tpu.dot_dimension_numbers<[1], [0], [0], [1], [0, 0, 1, 1], [], []>} : vector<8x3072xbf16>, vector<3072x128xbf16>, vector<8x128xf32> -> vector<8x128xf32>
    %c0_3 = arith.constant 0 : index
    %c0_4 = arith.constant 0 : index
    %4 = vector.load %arg3[%c0_3, %c0_4] : memref<1x128xf32, #tpu.memory_space<vmem>>, vector<1x128xf32>
    %5 = vector.broadcast %4 : vector<1x128xf32> to vector<8x128xf32>
    %6 = arith.addf %3, %5 : vector<8x128xf32>
    %cst_5 = arith.constant dense<0xFF800000> : vector<8xf32>
    %7 = vector.multi_reduction <maximumf>, %6, %cst_5 [1] : vector<8x128xf32> to vector<8xf32>
    %8 = vector.shape_cast %7 : vector<8xf32> to vector<8x1xf32>
    %9 = vector.broadcast %8 : vector<8x1xf32> to vector<8x128xf32>
    %10 = arith.subf %6, %9 : vector<8x128xf32>
    %11 = math.exp %10 : vector<8x128xf32>
    %cst_6 = arith.constant dense<0.000000e+00> : vector<8xf32>
    %12 = vector.multi_reduction <add>, %11, %cst_6 [1] : vector<8x128xf32> to vector<8xf32>
    %13 = vector.shape_cast %12 : vector<8xf32> to vector<8x1xf32>
    %14 = tpu.reciprocal %13 {approx = true} : vector<8x1xf32> -> vector<8x1xf32>
    %15 = vector.broadcast %14 : vector<8x1xf32> to vector<8x128xf32>
    %16 = arith.mulf %11, %15 : vector<8x128xf32>
    %c0_7 = arith.constant 0 : index
    %c0_8 = arith.constant 0 : index
    %17 = vector.load %arg4[%c0_7, %c0_8] : memref<8x128xf32, #tpu.memory_space<vmem>>, vector<8x128xf32>
    tpu.vector_store %arg4[%c0_7, %c0_8], %16 {strides = array<i32>} : memref<8x128xf32, #tpu.memory_space<vmem>>, vector<8x128xf32>,
    return
  }
  func.func @transform_0(%arg0: i32) -> (i32, i32) {
    %c0_i32 = arith.constant 0 : i32
    %c0_i32_0 = arith.constant 0 : i32
    return %arg0, %c0_i32 : i32, i32
  }
  func.func @transform_1(%arg0: i32) -> (i32, i32) {
    %c0_i32 = arith.constant 0 : i32
    %c0_i32_0 = arith.constant 0 : i32
    %c0_i32_1 = arith.constant 0 : i32
    return %c0_i32, %c0_i32_0 : i32, i32
  }
  func.func @transform_2(%arg0: i32) -> (i32, i32) {
    %c0_i32 = arith.constant 0 : i32
    %c0_i32_0 = arith.constant 0 : i32
    %c0_i32_1 = arith.constant 0 : i32
    return %c0_i32, %c0_i32_0 : i32, i32
  }
  func.func @transform_3(%arg0: i32) -> (i32, i32) {
    %c0_i32 = arith.constant 0 : i32
    %c0_i32_0 = arith.constant 0 : i32
    return %arg0, %c0_i32 : i32, i32
  }
}

</mosaic_0001>

<bundles_post_ra>
// kernel: logistic_forward.1
= control target key start
LH: loop header
LB: loop body
LE: loop exit
PB: predicated region body
PF: predicated region fallthrough
CT: control target
= control target key end

     0   :  { %8 = vsyncpa [#allocation3], 0  ;;  %s2795_s12 = smov [#allocation2]   ;;  %s2908_s0 = inlined_call_operand.vmem [shape: f32[8,3072], index: 0, kind: input, shape index: {}]   ;;  %s2909_s1 = inlined_call_operand.hbm [shape: bf16[3072,128], index: 1, kind: input, shape index: {}]   ;;  %s2910_s2 = inlined_call_operand.vmem [shape: f32[1,128], index: 2, kind: input, shape index: {}]   ;;  %s2911_s3 = inlined_call_operand.vmem [shape: f32[8,128], index: 3, kind: output, shape index: {}]  }
   0x1   :  { %s16_s13 = sshll.u32 %s2795_s12, 4  ;;  %s2771_s16 = scalar_lea.hbm %s2909_s1, 24576  ;;  %s17_s13 = int_to_ptr.vmem [resolvable:$true] %s16_s13 }
   0x2   :  { %p2772_p0 = scmp.ne.s32.totalorder %s2909_s1, %s2771_s16  ;;  %p2775_p1 = scmp.lt.u32.totalorder %s2771_s16, %s2909_s1 }
   0x4   :  { %p2777_p2 = pnand %p2775_p1, %p2772_p0 }
   0x6   :  { %2780 = shalt.err (!%p2777_p2)
}
   0x7   :  { %s2781_s21 = scalar_lea.vmem %s17_s13, 24576  ;;  %p2786_p4 = scmp.lt.s32.totalorder %s17_s13, %s17_s13 }
   0x8   :  { %p2782_p3 = scmp.ne.s32.totalorder %s17_s13, %s2781_s21  ;;  %p2787_p5 = scmp.lt.s32.totalorder %s2781_s21, %s2781_s21 }
   0xa   :  { %p2788_p6 = por %p2787_p5, %p2786_p4 }
   0xc   :  { %p2789_p7 = pnand %p2788_p6, %p2782_p3 }
   0xe   :  { %2792 = shalt.err (!%p2789_p7)
}
   0xf   :  { %s2796_s22 = smov 64   ;;  %s2797_s23 = smov 4  }
  0x10   :  { %22 = dma.hbm_to_vmem [thread:$0]  %s2909_s1, 24576, %s17_s13, [#allocation3], %s2796_s22, %s2796_s22, %s2797_s23  }
  0x11   :  { %2793 = dma.done.wait [#allocation3], 24576  }
  0x12   :  { %2794 = vsyncadd [#allocation3], 4294942720  ;;  %v2575_v0 = vld [vmem:[#allocation2 + $0x40] sm:$0xff]   ;;  %v2579_v4 = vld [vmem:[#allocation2 + $0x48] sm:$0xff]  }
  0x13   :  { %v2576_v1 = vld [vmem:[#allocation2 + $0xc0] sm:$0xff]   ;;  %2308 = vmatprep.subr.bf16.mxu0 %v2575_v0  ;;  %v2580_v5 = vld [vmem:[#allocation2 + $0xc8] sm:$0xff]   ;;  %v2583_v8 = vld [vmem:[#allocation2 + $0x50] sm:$0xff]  }
  0x14   :  { %v2577_v2 = vld [vmem:[#allocation2] sm:$0xff]   ;;  %2330 = vmatprep.subr.bf16.mxu1 %v2576_v1  ;;  %v2581_v6 = vld [vmem:[#allocation2 + $0x8] sm:$0xff]   ;;  %v2584_v9 = vld [vmem:[#allocation2 + $0xd0] sm:$0xff]  }
  0x15   :  { %v2578_v3 = vld [vmem:[#allocation2 + $0x80] sm:$0xff]   ;;  %2309 = vmatpush3.bf16.msra.mxu0 %v2577_v2  ;;  %v2582_v7 = vld [vmem:[#allocation2 + $0x88] sm:$0xff]   ;;  %v2585_v10 = vld [vmem:[#allocation2 + $0x10] sm:$0xff]  }
  0x16   :  { %2331 = vmatpush3.bf16.msra.mxu1 %v2578_v3  ;;  %2310 = vmatprep.subr.bf16.mxu0 %v2579_v4  ;;  %v2586_v11 = vld [vmem:[#allocation2 + $0x90] sm:$0xff]   ;;  %v2587_v12 = vld [vmem:[#allocation2 + $0x58] sm:$0xff]   ;;  %v2591_v16 = vld [vmem:[#allocation2 + $0x60] sm:$0xff]  }
  0x17   :  { %2332 = vmatprep.subr.bf16.mxu1 %v2580_v5  ;;  %v2588_v13 = vld [vmem:[#allocation2 + $0xd8] sm:$0xff]   ;;  %v2592_v17 = vld [vmem:[#allocation2 + $0xe0] sm:$0xff]   ;;  %v2595_v20 = vld [vmem:[#allocation2 + $0x68] sm:$0xff]  }
  0x18   :  { %v2589_v14 = vld [vmem:[#allocation2 + $0x18] sm:$0xff]   ;;  %v2593_v18 = vld [vmem:[#allocation2 + $0x20] sm:$0xff]   ;;  %v2596_v21 = vld [vmem:[#allocation2 + $0xe8] sm:$0xff]  }
  0x19   :  { %2311 = vmatpush3.bf16.msra.mxu0 %v2581_v6  ;;  %v2590_v15 = vld [vmem:[#allocation2 + $0x98] sm:$0xff]   ;;  %v2594_v19 = vld [vmem:[#allocation2 + $0xa0] sm:$0xff]   ;;  %v2597_v22 = vld [vmem:[#allocation2 + $0x28] sm:$0xff]  }
  0x1a   :  { %2333 = vmatpush3.bf16.msra.mxu1 %v2582_v7  ;;  %2312 = vmatprep.subr.bf16.mxu0 %v2583_v8  ;;  %v2598_v23 = vld [vmem:[#allocation2 + $0xa8] sm:$0xff]   ;;  %v2599_v24 = vld [vmem:[#allocation2 + $0x70] sm:$0xff]   ;;  %v2603_v28 = vld [vmem:[#allocation2 + $0x78] sm:$0xff]  }
  0x1b   :  { %2334 = vmatprep.subr.bf16.mxu1 %v2584_v9  ;;  %v2600_v25 = vld [vmem:[#allocation2 + $0xf0] sm:$0xff]   ;;  %v2604_v29 = vld [vmem:[#allocation2 + $0xf8] sm:$0xff]   ;;  %v30_v32 = vld [vmem:[%s2908_s0 + $0x8] sm:$0xff] }
  0x1c   :  { %v2601_v26 = vld [vmem:[#allocation2 + $0x30] sm:$0xff]   ;;  %v2605_v30 = vld [vmem:[#allocation2 + $0x38] sm:$0xff]   ;;  %v29_v34 = vld [vmem:[%s2908_s0] sm:$0xff]  ;;  %v54_v35 = vpack.c.bf16 %v30_v32, %v30_v32 }
  0x1d   :  { %2313 = vmatpush3.bf16.msra.mxu0 %v2585_v10  ;;  %v2602_v27 = vld [vmem:[#allocation2 + $0xb0] sm:$0xff]   ;;  %v2606_v31 = vld [vmem:[#allocation2 + $0xb8] sm:$0xff]   ;;  %v53_v37 = vpack.c.bf16 %v29_v34, %v29_v34  ;;  %v2607_v40 = vld [vmem:[#allocation2 + $0x140] sm:$0xff]  }
  0x1e   :  { %2335 = vmatpush3.bf16.msra.mxu1 %v2586_v11  ;;  %2314 = vmatprep.subr.bf16.mxu0 %v2587_v12  ;;  %v32_v33 = vld [vmem:[%s2908_s0 + $0x18] sm:$0xff]  ;;  %v31_v38 = vld [vmem:[%s2908_s0 + $0x10] sm:$0xff]  ;;  %v2608_v41 = vld [vmem:[#allocation2 + $0x1c0] sm:$0xff]  }
  0x1f   :  { %2336 = vmatprep.subr.bf16.mxu1 %v2588_v13  ;;  %v56_v36 = vpack.c.bf16 %v32_v33, %v32_v33  ;;  %v55_v39 = vpack.c.bf16 %v31_v38, %v31_v38  ;;  %1652 = vmatprep.mubr.bf16.mxu0 %v54_v35  ;;  %v2609_v42 = vld [vmem:[#allocation2 + $0x100] sm:$0xff]   ;;  %v2611_v44 = vld [vmem:[#allocation2 + $0x148] sm:$0xff]   ;;  %v2615_v48 = vld [vmem:[#allocation2 + $0x150] sm:$0xff]  }
  0x20   :  { %v2610_v43 = vld [vmem:[#allocation2 + $0x180] sm:$0xff]   ;;  %v2612_v45 = vld [vmem:[#allocation2 + $0x1c8] sm:$0xff]   ;;  %v2616_v49 = vld [vmem:[#allocation2 + $0x1d0] sm:$0xff]  }
  0x21   :  { %2315 = vmatpush3.bf16.msra.mxu0 %v2589_v14  ;;  %1692 = vmatprep.mubr.bf16.mxu1 %v56_v36  ;;  %v2613_v46 = vld [vmem:[#allocation2 + $0x108] sm:$0xff]   ;;  %v2617_v50 = vld [vmem:[#allocation2 + $0x110] sm:$0xff]   ;;  %v2619_v52 = vld [vmem:[#allocation2 + $0x158] sm:$0xff]  }
  0x22   :  { %2337 = vmatpush3.bf16.msra.mxu1 %v2590_v15  ;;  %2316 = vmatprep.subr.bf16.mxu0 %v2591_v16  ;;  %v2614_v47 = vld [vmem:[#allocation2 + $0x188] sm:$0xff]   ;;  %v2618_v51 = vld [vmem:[#allocation2 + $0x190] sm:$0xff]   ;;  %v2620_v53 = vld [vmem:[#allocation2 + $0x1d8] sm:$0xff]  }
  0x23   :  { %2338 = vmatprep.subr.bf16.mxu1 %v2592_v17  ;;  %v2621_v54 = vld [vmem:[#allocation2 + $0x118] sm:$0xff]   ;;  %v2623_v56 = vld [vmem:[#allocation2 + $0x160] sm:$0xff]   ;;  %v2627_v60 = vld [vmem:[#allocation2 + $0x168] sm:$0xff]  }
  0x24   :  { %v2622_v55 = vld [vmem:[#allocation2 + $0x198] sm:$0xff]   ;;  %v2624_v57 = vld [vmem:[#allocation2 + $0x1e0] sm:$0xff]   ;;  %v2628_v61 = vld [vmem:[#allocation2 + $0x1e8] sm:$0xff]  }
  0x25   :  { %2317 = vmatpush3.bf16.msra.mxu0 %v2593_v18  ;;  %v2625_v58 = vld [vmem:[#allocation2 + $0x120] sm:$0xff]   ;;  %v2629_v62 = vld [vmem:[#allocation2 + $0x128] sm:$0xff]   ;;  %v2631_v0 = vld [vmem:[#allocation2 + $0x170] sm:$0xff]  }
  0x26   :  { %2339 = vmatpush3.bf16.msra.mxu1 %v2594_v19  ;;  %2318 = vmatprep.subr.bf16.mxu0 %v2595_v20  ;;  %v2626_v59 = vld [vmem:[#allocation2 + $0x1a0] sm:$0xff]   ;;  %v2630_v63 = vld [vmem:[#allocation2 + $0x1a8] sm:$0xff]   ;;  %v2632_v1 = vld [vmem:[#allocation2 + $0x1f0] sm:$0xff]  }
  0x27   :  { %2340 = vmatprep.subr.bf16.mxu1 %v2596_v21  ;;  %v2633_v2 = vld [vmem:[#allocation2 + $0x130] sm:$0xff]   ;;  %v2635_v4 = vld [vmem:[#allocation2 + $0x178] sm:$0xff]   ;;  %v34_v8 = vld [vmem:[%s2908_s0 + $0x28] sm:$0xff] }
  0x28   :  { %v2634_v3 = vld [vmem:[#allocation2 + $0x1b0] sm:$0xff]   ;;  %v2636_v5 = vld [vmem:[#allocation2 + $0x1f8] sm:$0xff]   ;;  %v58_v10 = vpack.c.bf16 %v34_v8, %v34_v8  ;;  %v33_v12 = vld [vmem:[%s2908_s0 + $0x20] sm:$0xff] }
  0x29   :  { %2319 = vmatpush3.bf16.msra.mxu0 %v2597_v22  ;;  %v2637_v6 = vld [vmem:[#allocation2 + $0x138] sm:$0xff]   ;;  %v35_v13 = vld [vmem:[%s2908_s0 + $0x30] sm:$0xff]  ;;  %v57_v14 = vpack.c.bf16 %v33_v12, %v33_v12  ;;  %v2639_v16 = vld [vmem:[#allocation2 + $0x240] sm:$0xff]  }
  0x2a   :  { %2341 = vmatpush3.bf16.msra.mxu1 %v2598_v23  ;;  %2320 = vmatprep.subr.bf16.mxu0 %v2599_v24  ;;  %v2638_v7 = vld [vmem:[#allocation2 + $0x1b8] sm:$0xff]   ;;  %v59_v15 = vpack.c.bf16 %v35_v13, %v35_v13  ;;  %v2640_v17 = vld [vmem:[#allocation2 + $0x2c0] sm:$0xff]   ;;  %v2643_v20 = vld [vmem:[#allocation2 + $0x248] sm:$0xff]  }
  0x2b   :  { %2342 = vmatprep.subr.bf16.mxu1 %v2600_v25  ;;  %v36_v9 = vld [vmem:[%s2908_s0 + $0x38] sm:$0xff]  ;;  %v2641_v18 = vld [vmem:[#allocation2 + $0x200] sm:$0xff]   ;;  %v2644_v21 = vld [vmem:[#allocation2 + $0x2c8] sm:$0xff]  }
  0x2c   :  { %v60_v11 = vpack.c.bf16 %v36_v9, %v36_v9  ;;  %v2642_v19 = vld [vmem:[#allocation2 + $0x280] sm:$0xff]   ;;  %v2645_v22 = vld [vmem:[#allocation2 + $0x208] sm:$0xff]   ;;  %v2647_v24 = vld [vmem:[#allocation2 + $0x250] sm:$0xff]  }
  0x2d   :  { %2321 = vmatpush3.bf16.msra.mxu0 %v2601_v26  ;;  %v2646_v23 = vld [vmem:[#allocation2 + $0x288] sm:$0xff]   ;;  %v2648_v25 = vld [vmem:[#allocation2 + $0x2d0] sm:$0xff]   ;;  %v2655_v32 = vld [vmem:[#allocation2 + $0x260] sm:$0xff]  }
  0x2e   :  { %2343 = vmatpush3.bf16.msra.mxu1 %v2602_v27  ;;  %2322 = vmatprep.subr.bf16.mxu0 %v2603_v28  ;;  %v2649_v26 = vld [vmem:[#allocation2 + $0x210] sm:$0xff]   ;;  %v2651_v28 = vld [vmem:[#allocation2 + $0x258] sm:$0xff]   ;;  %v2656_v33 = vld [vmem:[#allocation2 + $0x2e0] sm:$0xff]  }
  0x2f   :  { %2344 = vmatprep.subr.bf16.mxu1 %v2604_v29  ;;  %v2650_v27 = vld [vmem:[#allocation2 + $0x290] sm:$0xff]   ;;  %v2652_v29 = vld [vmem:[#allocation2 + $0x2d8] sm:$0xff]   ;;  %v2657_v34 = vld [vmem:[#allocation2 + $0x220] sm:$0xff]  }
  0x30   :  { %v2658_v35 = vld [vmem:[#allocation2 + $0x2a0] sm:$0xff]   ;;  %v2659_v36 = vld [vmem:[#allocation2 + $0x268] sm:$0xff]  }
  0x31   :  { %2323 = vmatpush3.bf16.msra.mxu0 %v2605_v30  ;;  %v2653_v30 = vld [vmem:[#allocation2 + $0x218] sm:$0xff]   ;;  %v2661_v38 = vld [vmem:[#allocation2 + $0x228] sm:$0xff]   ;;  %v2687_v8 = vld [vmem:[#allocation2 + $0x360] sm:$0xff]  }
  0x32   :  { %2345 = vmatpush3.bf16.msra.mxu1 %v2606_v31  ;;  %2352 = vmatprep.subr.bf16.mxu0 %v2607_v40  ;;  %v2654_v31 = vld [vmem:[#allocation2 + $0x298] sm:$0xff]   ;;  %v2663_v40 = vld [vmem:[#allocation2 + $0x270] sm:$0xff]   ;;  %v2688_v9 = vld [vmem:[#allocation2 + $0x3e0] sm:$0xff]  }
  0x33   :  { %2374 = vmatprep.subr.bf16.mxu1 %v2608_v41  ;;  %v2664_v41 = vld [vmem:[#allocation2 + $0x2f0] sm:$0xff]   ;;  %v2691_v12 = vld [vmem:[#allocation2 + $0x368] sm:$0xff]  }
  0x34   :  { %1653 = vmatmul.mubr.bf16.vlgmr.msra.gmra.mrb[0].mxu0 %v53_v37  ;;  %v2660_v37 = vld [vmem:[#allocation2 + $0x2e8] sm:$0xff]  }
  0x35   :  { %1693 = vmatmul.mubr.bf16.vlgmr.msra.gmra.mrb[0].mxu1 %v55_v39  ;;  %2353 = vmatpush3.bf16.msra.mxu0 %v2609_v42  ;;  %v2662_v39 = vld [vmem:[#allocation2 + $0x2a8] sm:$0xff]   ;;  %v2665_v42 = vld [vmem:[#allocation2 + $0x230] sm:$0xff]  }
  0x36   :  { %2375 = vmatpush3.bf16.msra.mxu1 %v2610_v43  ;;  %2354 = vmatprep.subr.bf16.mxu0 %v2611_v44  ;;  %v2666_v43 = vld [vmem:[#allocation2 + $0x2b0] sm:$0xff]   ;;  %v2667_v44 = vld [vmem:[#allocation2 + $0x278] sm:$0xff]   ;;  %v2692_v13 = vld [vmem:[#allocation2 + $0x3e8] sm:$0xff]  }
  0x37   :  { %2376 = vmatprep.subr.bf16.mxu1 %v2612_v45  ;;  %1732 = vmatprep.mubr.bf16.mxu0 %v58_v10  ;;  %v2668_v45 = vld [vmem:[#allocation2 + $0x2f8] sm:$0xff]   ;;  %v2689_v10 = vld [vmem:[#allocation2 + $0x320] sm:$0xff]  }
  0x38   :  { %1772 = vmatprep.mubr.bf16.mxu1 %v60_v11  ;;  %v2690_v11 = vld [vmem:[#allocation2 + $0x3a0] sm:$0xff]  }
  0x39   :  { %2355 = vmatpush3.bf16.msra.mxu0 %v2613_v46  ;;  %v2669_v46 = vld [vmem:[#allocation2 + $0x238] sm:$0xff]  }
  0x3a   :  { %2377 = vmatpush3.bf16.msra.mxu1 %v2614_v47  ;;  %2356 = vmatprep.subr.bf16.mxu0 %v2615_v48  ;;  %v2670_v47 = vld [vmem:[#allocation2 + $0x2b8] sm:$0xff]   ;;  %v38_v48 = vld [vmem:[%s2908_s0 + $0x48] sm:$0xff] }
  0x3b   :  { %2378 = vmatprep.subr.bf16.mxu1 %v2616_v49  ;;  %v62_v49 = vpack.c.bf16 %v38_v48, %v38_v48  ;;  %v2719_v48 = vld [vmem:[#allocation2 + $0x460] sm:$0xff]  }
  0x3d   :  { %2357 = vmatpush3.bf16.msra.mxu0 %v2617_v50  ;;  %v40_v50 = vld [vmem:[%s2908_s0 + $0x58] sm:$0xff] }
  0x3e   :  { %2379 = vmatpush3.bf16.msra.mxu1 %v2618_v51  ;;  %2358 = vmatprep.subr.bf16.mxu0 %v2619_v52  ;;  %v37_v51 = vld [vmem:[%s2908_s0 + $0x40] sm:$0xff]  ;;  %v39_v52 = vld [vmem:[%s2908_s0 + $0x50] sm:$0xff] }
  0x3f   :  { %2380 = vmatprep.subr.bf16.mxu1 %v2620_v53  ;;  %v64_v53 = vpack.c.bf16 %v40_v50, %v40_v50  ;;  %v2721_v50 = vld [vmem:[#allocation2 + $0x420] sm:$0xff]  }
  0x41   :  { %2359 = vmatpush3.bf16.msra.mxu0 %v2621_v54  ;;  %v61_v54 = vpack.c.bf16 %v37_v51, %v37_v51  ;;  %v2722_v51 = vld [vmem:[#allocation2 + $0x4a0] sm:$0xff]  }
  0x42   :  { %2381 = vmatpush3.bf16.msra.mxu1 %v2622_v55  ;;  %2360 = vmatprep.subr.bf16.mxu0 %v2623_v56  ;;  %v63_v55 = vpack.c.bf16 %v39_v52, %v39_v52  ;;  %v2671_v56 = vld [vmem:[#allocation2 + $0x340] sm:$0xff]   ;;  %v2723_v52 = vld [vmem:[#allocation2 + $0x468] sm:$0xff]  }
  0x43   :  { %2382 = vmatprep.subr.bf16.mxu1 %v2624_v57  ;;  %v2672_v57 = vld [vmem:[#allocation2 + $0x3c0] sm:$0xff]  }
  0x45   :  { %2361 = vmatpush3.bf16.msra.mxu0 %v2625_v58  ;;  %v2673_v58 = vld [vmem:[#allocation2 + $0x300] sm:$0xff]  }
  0x46   :  { %2383 = vmatpush3.bf16.msra.mxu1 %v2626_v59  ;;  %2362 = vmatprep.subr.bf16.mxu0 %v2627_v60  ;;  %v2674_v59 = vld [vmem:[#allocation2 + $0x380] sm:$0xff]   ;;  %v2675_v60 = vld [vmem:[#allocation2 + $0x348] sm:$0xff]  }
  0x47   :  { %2384 = vmatprep.subr.bf16.mxu1 %v2628_v61  ;;  %v2676_v61 = vld [vmem:[#allocation2 + $0x3c8] sm:$0xff]  }
  0x49   :  { %2363 = vmatpush3.bf16.msra.mxu0 %v2629_v62  ;;  %v2677_v62 = vld [vmem:[#allocation2 + $0x308] sm:$0xff]  }
  0x4a   :  { %2385 = vmatpush3.bf16.msra.mxu1 %v2630_v63  ;;  %2364 = vmatprep.subr.bf16.mxu0 %v2631_v0  ;;  %v2678_v63 = vld [vmem:[#allocation2 + $0x388] sm:$0xff]   ;;  %v2679_v0 = vld [vmem:[#allocation2 + $0x350] sm:$0xff]  }
  0x4b   :  { %2386 = vmatprep.subr.bf16.mxu1 %v2632_v1  ;;  %v2680_v1 = vld [vmem:[#allocation2 + $0x3d0] sm:$0xff]  }
  0x4d   :  { %2365 = vmatpush3.bf16.msra.mxu0 %v2633_v2  ;;  %v2681_v2 = vld [vmem:[#allocation2 + $0x310] sm:$0xff]  }
  0x4e   :  { %2387 = vmatpush3.bf16.msra.mxu1 %v2634_v3  ;;  %2366 = vmatprep.subr.bf16.mxu0 %v2635_v4  ;;  %v2682_v3 = vld [vmem:[#allocation2 + $0x390] sm:$0xff]   ;;  %v2683_v4 = vld [vmem:[#allocation2 + $0x358] sm:$0xff]  }
  0x4f   :  { %2388 = vmatprep.subr.bf16.mxu1 %v2636_v5  ;;  %v2684_v5 = vld [vmem:[#allocation2 + $0x3d8] sm:$0xff]  }
  0x51   :  { %2367 = vmatpush3.bf16.msra.mxu0 %v2637_v6  ;;  %v2685_v6 = vld [vmem:[#allocation2 + $0x318] sm:$0xff]  }
  0x52   :  { %2389 = vmatpush3.bf16.msra.mxu1 %v2638_v7  ;;  %2396 = vmatprep.subr.bf16.mxu0 %v2639_v16  ;;  %v2686_v7 = vld [vmem:[#allocation2 + $0x398] sm:$0xff]   ;;  %v2695_v16 = vld [vmem:[#allocation2 + $0x370] sm:$0xff]  }
  0x53   :  { %2418 = vmatprep.subr.bf16.mxu1 %v2640_v17  ;;  %v2696_v17 = vld [vmem:[#allocation2 + $0x3f0] sm:$0xff]  }
  0x54   :  { %1733 = vmatmul.mubr.bf16.vlgmr.msra.gmra.mrb[4].mxu0 %v57_v14  ;;  %v2693_v14 = vld [vmem:[#allocation2 + $0x328] sm:$0xff]  }
  0x55   :  { %1773 = vmatmul.mubr.bf16.vlgmr.msra.gmra.mrb[4].mxu1 %v59_v15  ;;  %2397 = vmatpush3.bf16.msra.mxu0 %v2641_v18  ;;  %v2694_v15 = vld [vmem:[#allocation2 + $0x3a8] sm:$0xff]   ;;  %v2697_v18 = vld [vmem:[#allocation2 + $0x330] sm:$0xff]  }
  0x56   :  { %2419 = vmatpush3.bf16.msra.mxu1 %v2642_v19  ;;  %2398 = vmatprep.subr.bf16.mxu0 %v2643_v20  ;;  %v2698_v19 = vld [vmem:[#allocation2 + $0x3b0] sm:$0xff]   ;;  %v2699_v20 = vld [vmem:[#allocation2 + $0x378] sm:$0xff]  }
  0x57   :  { %2420 = vmatprep.subr.bf16.mxu1 %v2644_v21  ;;  %1812 = vmatprep.mubr.bf16.mxu0 %v62_v49  ;;  %v2700_v21 = vld [vmem:[#allocation2 + $0x3f8] sm:$0xff]   ;;  %v2720_v49 = vld [vmem:[#allocation2 + $0x4e0] sm:$0xff]  }
  0x58   :  { %1852 = vmatprep.mubr.bf16.mxu1 %v64_v53  ;;  %v2724_v53 = vld [vmem:[#allocation2 + $0x4e8] sm:$0xff]  }
  0x59   :  { %2399 = vmatpush3.bf16.msra.mxu0 %v2645_v22  ;;  %v2701_v22 = vld [vmem:[#allocation2 + $0x338] sm:$0xff]  }
  0x5a   :  { %2421 = vmatpush3.bf16.msra.mxu1 %v2646_v23  ;;  %2400 = vmatprep.subr.bf16.mxu0 %v2647_v24  ;;  %v2702_v23 = vld [vmem:[#allocation2 + $0x3b8] sm:$0xff]   ;;  %v42_v24 = vld [vmem:[%s2908_s0 + $0x68] sm:$0xff] }
  0x5b   :  { %2422 = vmatprep.subr.bf16.mxu1 %v2648_v25  ;;  %v44_v25 = vld [vmem:[%s2908_s0 + $0x78] sm:$0xff] }
  0x5d   :  { %2401 = vmatpush3.bf16.msra.mxu0 %v2649_v26  ;;  %v41_v26 = vld [vmem:[%s2908_s0 + $0x60] sm:$0xff] }
  0x5e   :  { %2423 = vmatpush3.bf16.msra.mxu1 %v2650_v27  ;;  %2402 = vmatprep.subr.bf16.mxu0 %v2651_v28  ;;  %v66_v27 = vpack.c.bf16 %v42_v24, %v42_v24  ;;  %v68_v28 = vpack.c.bf16 %v44_v25, %v44_v25  ;;  %v2751_v24 = vld [vmem:[#allocation2 + $0x560] sm:$0xff]  }
  0x5f   :  { %2424 = vmatprep.subr.bf16.mxu1 %v2652_v29  ;;  %v65_v29 = vpack.c.bf16 %v41_v26, %v41_v26  ;;  %v2752_v25 = vld [vmem:[#allocation2 + $0x5e0] sm:$0xff]  }
  0x60   :  { %v2753_v26 = vld [vmem:[#allocation2 + $0x520] sm:$0xff]  }
  0x61   :  { %2403 = vmatpush3.bf16.msra.mxu0 %v2653_v30  ;;  %v43_v30 = vld [vmem:[%s2908_s0 + $0x70] sm:$0xff] }
  0x62   :  { %2425 = vmatpush3.bf16.msra.mxu1 %v2654_v31  ;;  %2404 = vmatprep.subr.bf16.mxu0 %v2655_v32  ;;  %v67_v31 = vpack.c.bf16 %v43_v30, %v43_v30  ;;  %v2703_v32 = vld [vmem:[#allocation2 + $0x440] sm:$0xff]   ;;  %v2757_v30 = vld [vmem:[#allocation2 + $0x528] sm:$0xff]  }
  0x63   :  { %2426 = vmatprep.subr.bf16.mxu1 %v2656_v33  ;;  %v2704_v33 = vld [vmem:[#allocation2 + $0x4c0] sm:$0xff]  }
  0x65   :  { %2405 = vmatpush3.bf16.msra.mxu0 %v2657_v34  ;;  %v2705_v34 = vld [vmem:[#allocation2 + $0x400] sm:$0xff]  }
  0x66   :  { %2427 = vmatpush3.bf16.msra.mxu1 %v2658_v35  ;;  %2406 = vmatprep.subr.bf16.mxu0 %v2659_v36  ;;  %v2706_v35 = vld [vmem:[#allocation2 + $0x480] sm:$0xff]   ;;  %v2707_v36 = vld [vmem:[#allocation2 + $0x448] sm:$0xff]  }
  0x67   :  { %2428 = vmatprep.subr.bf16.mxu1 %v2660_v37  ;;  %v2708_v37 = vld [vmem:[#allocation2 + $0x4c8] sm:$0xff]  }
  0x69   :  { %2407 = vmatpush3.bf16.msra.mxu0 %v2661_v38  ;;  %v2709_v38 = vld [vmem:[#allocation2 + $0x408] sm:$0xff]  }
  0x6a   :  { %2429 = vmatpush3.bf16.msra.mxu1 %v2662_v39  ;;  %2408 = vmatprep.subr.bf16.mxu0 %v2663_v40  ;;  %v2710_v39 = vld [vmem:[#allocation2 + $0x488] sm:$0xff]   ;;  %v2711_v40 = vld [vmem:[#allocation2 + $0x450] sm:$0xff]  }
  0x6b   :  { %2430 = vmatprep.subr.bf16.mxu1 %v2664_v41  ;;  %v2712_v41 = vld [vmem:[#allocation2 + $0x4d0] sm:$0xff]  }
  0x6d   :  { %2409 = vmatpush3.bf16.msra.mxu0 %v2665_v42  ;;  %v2713_v42 = vld [vmem:[#allocation2 + $0x410] sm:$0xff]  }
  0x6e   :  { %2431 = vmatpush3.bf16.msra.mxu1 %v2666_v43  ;;  %2410 = vmatprep.subr.bf16.mxu0 %v2667_v44  ;;  %v2714_v43 = vld [vmem:[#allocation2 + $0x490] sm:$0xff]   ;;  %v2715_v44 = vld [vmem:[#allocation2 + $0x458] sm:$0xff]  }
  0x6f   :  { %2432 = vmatprep.subr.bf16.mxu1 %v2668_v45  ;;  %v2716_v45 = vld [vmem:[#allocation2 + $0x4d8] sm:$0xff]  }
  0x71   :  { %2411 = vmatpush3.bf16.msra.mxu0 %v2669_v46  ;;  %v2717_v46 = vld [vmem:[#allocation2 + $0x418] sm:$0xff]  }
  0x72   :  { %2433 = vmatpush3.bf16.msra.mxu1 %v2670_v47  ;;  %2440 = vmatprep.subr.bf16.mxu0 %v2671_v56  ;;  %v2718_v47 = vld [vmem:[#allocation2 + $0x498] sm:$0xff]   ;;  %v2727_v56 = vld [vmem:[#allocation2 + $0x470] sm:$0xff]  }
  0x73   :  { %2462 = vmatprep.subr.bf16.mxu1 %v2672_v57  ;;  %v2728_v57 = vld [vmem:[#allocation2 + $0x4f0] sm:$0xff]  }
  0x74   :  { %1813 = vmatmul.mubr.bf16.vlgmr.msra.gmra.mrb[8].mxu0 %v61_v54  ;;  %v2725_v54 = vld [vmem:[#allocation2 + $0x428] sm:$0xff]  }
  0x75   :  { %1853 = vmatmul.mubr.bf16.vlgmr.msra.gmra.mrb[8].mxu1 %v63_v55  ;;  %2441 = vmatpush3.bf16.msra.mxu0 %v2673_v58  ;;  %v2726_v55 = vld [vmem:[#allocation2 + $0x4a8] sm:$0xff]   ;;  %v2729_v58 = vld [vmem:[#allocation2 + $0x430] sm:$0xff]  }
  0x76   :  { %2463 = vmatpush3.bf16.msra.mxu1 %v2674_v59  ;;  %2442 = vmatprep.subr.bf16.mxu0 %v2675_v60  ;;  %v2730_v59 = vld [vmem:[#allocation2 + $0x4b0] sm:$0xff]   ;;  %v2731_v60 = vld [vmem:[#allocation2 + $0x478] sm:$0xff]  }
  0x77   :  { %2464 = vmatprep.subr.bf16.mxu1 %v2676_v61  ;;  %1892 = vmatprep.mubr.bf16.mxu0 %v66_v27  ;;  %v2732_v61 = vld [vmem:[#allocation2 + $0x4f8] sm:$0xff]   ;;  %v2754_v27 = vld [vmem:[#allocation2 + $0x5a0] sm:$0xff]  }
  0x78   :  { %1932 = vmatprep.mubr.bf16.mxu1 %v68_v28  ;;  %v2755_v28 = vld [vmem:[#allocation2 + $0x568] sm:$0xff]  }
  0x79   :  { %2443 = vmatpush3.bf16.msra.mxu0 %v2677_v62  ;;  %v2733_v62 = vld [vmem:[#allocation2 + $0x438] sm:$0xff]  }
  0x7a   :  { %2465 = vmatpush3.bf16.msra.mxu1 %v2678_v63  ;;  %2444 = vmatprep.subr.bf16.mxu0 %v2679_v0  ;;  %v2734_v63 = vld [vmem:[#allocation2 + $0x4b8] sm:$0xff]   ;;  %v46_v0 = vld [vmem:[%s2908_s0 + $0x88] sm:$0xff] }
  0x7b   :  { %2466 = vmatprep.subr.bf16.mxu1 %v2680_v1  ;;  %v48_v1 = vld [vmem:[%s2908_s0 + $0x98] sm:$0xff] }
  0x7d   :  { %2445 = vmatpush3.bf16.msra.mxu0 %v2681_v2  ;;  %v70_v2 = vpack.c.bf16 %v46_v0, %v46_v0 }
  0x7e   :  { %2467 = vmatpush3.bf16.msra.mxu1 %v2682_v3  ;;  %2446 = vmatprep.subr.bf16.mxu0 %v2683_v4  ;;  %v72_v3 = vpack.c.bf16 %v48_v1, %v48_v1  ;;  %v45_v4 = vld [vmem:[%s2908_s0 + $0x80] sm:$0xff] }
  0x7f   :  { %2468 = vmatprep.subr.bf16.mxu1 %v2684_v5  ;;  %v47_v5 = vld [vmem:[%s2908_s0 + $0x90] sm:$0xff] }
  0x81   :  { %2447 = vmatpush3.bf16.msra.mxu0 %v2685_v6  ;;  %v69_v6 = vpack.c.bf16 %v45_v4, %v45_v4 }
  0x82   :  { %2469 = vmatpush3.bf16.msra.mxu1 %v2686_v7  ;;  %2448 = vmatprep.subr.bf16.mxu0 %v2687_v8  ;;  %v71_v7 = vpack.c.bf16 %v47_v5, %v47_v5  ;;  %v2735_v8 = vld [vmem:[#allocation2 + $0x540] sm:$0xff]  }
  0x83   :  { %2470 = vmatprep.subr.bf16.mxu1 %v2688_v9  ;;  %v2736_v9 = vld [vmem:[#allocation2 + $0x5c0] sm:$0xff]  }
  0x85   :  { %2449 = vmatpush3.bf16.msra.mxu0 %v2689_v10  ;;  %v2737_v10 = vld [vmem:[#allocation2 + $0x500] sm:$0xff]  }
  0x86   :  { %2471 = vmatpush3.bf16.msra.mxu1 %v2690_v11  ;;  %2450 = vmatprep.subr.bf16.mxu0 %v2691_v12  ;;  %v2738_v11 = vld [vmem:[#allocation2 + $0x580] sm:$0xff]   ;;  %v2739_v12 = vld [vmem:[#allocation2 + $0x548] sm:$0xff]  }
  0x87   :  { %2472 = vmatprep.subr.bf16.mxu1 %v2692_v13  ;;  %v2740_v13 = vld [vmem:[#allocation2 + $0x5c8] sm:$0xff]  }
  0x89   :  { %2451 = vmatpush3.bf16.msra.mxu0 %v2693_v14  ;;  %v2741_v14 = vld [vmem:[#allocation2 + $0x508] sm:$0xff]  }
  0x8a   :  { %2473 = vmatpush3.bf16.msra.mxu1 %v2694_v15  ;;  %2452 = vmatprep.subr.bf16.mxu0 %v2695_v16  ;;  %v2742_v15 = vld [vmem:[#allocation2 + $0x588] sm:$0xff]   ;;  %v2743_v16 = vld [vmem:[#allocation2 + $0x550] sm:$0xff]  }
  0x8b   :  { %2474 = vmatprep.subr.bf16.mxu1 %v2696_v17  ;;  %v2744_v17 = vld [vmem:[#allocation2 + $0x5d0] sm:$0xff]  }
  0x8d   :  { %2453 = vmatpush3.bf16.msra.mxu0 %v2697_v18  ;;  %v2745_v18 = vld [vmem:[#allocation2 + $0x510] sm:$0xff]  }
  0x8e   :  { %2475 = vmatpush3.bf16.msra.mxu1 %v2698_v19  ;;  %2454 = vmatprep.subr.bf16.mxu0 %v2699_v20  ;;  %v2746_v19 = vld [vmem:[#allocation2 + $0x590] sm:$0xff]   ;;  %v2747_v20 = vld [vmem:[#allocation2 + $0x558] sm:$0xff]  }
  0x8f   :  { %2476 = vmatprep.subr.bf16.mxu1 %v2700_v21  ;;  %v2748_v21 = vld [vmem:[#allocation2 + $0x5d8] sm:$0xff]  }
  0x91   :  { %2455 = vmatpush3.bf16.msra.mxu0 %v2701_v22  ;;  %v2749_v22 = vld [vmem:[#allocation2 + $0x518] sm:$0xff]  }
  0x92   :  { %2477 = vmatpush3.bf16.msra.mxu1 %v2702_v23  ;;  %2484 = vmatprep.subr.bf16.mxu0 %v2703_v32  ;;  %v2750_v23 = vld [vmem:[#allocation2 + $0x598] sm:$0xff]   ;;  %v2759_v32 = vld [vmem:[#allocation2 + $0x570] sm:$0xff]  }
  0x93   :  { %2506 = vmatprep.subr.bf16.mxu1 %v2704_v33  ;;  %v2760_v33 = vld [vmem:[#allocation2 + $0x5f0] sm:$0xff]  }
  0x94   :  { %1893 = vmatmul.mubr.bf16.vlgmr.msra.gmra.mrb[12].mxu0 %v65_v29  ;;  %v2756_v29 = vld [vmem:[#allocation2 + $0x5e8] sm:$0xff]  }
  0x95   :  { %1933 = vmatmul.mubr.bf16.vlgmr.msra.gmra.mrb[12].mxu1 %v67_v31  ;;  %2485 = vmatpush3.bf16.msra.mxu0 %v2705_v34  ;;  %v2758_v31 = vld [vmem:[#allocation2 + $0x5a8] sm:$0xff]   ;;  %v2761_v34 = vld [vmem:[#allocation2 + $0x530] sm:$0xff]  }
  0x96   :  { %2507 = vmatpush3.bf16.msra.mxu1 %v2706_v35  ;;  %2486 = vmatprep.subr.bf16.mxu0 %v2707_v36  ;;  %v2762_v35 = vld [vmem:[#allocation2 + $0x5b0] sm:$0xff]   ;;  %v2763_v36 = vld [vmem:[#allocation2 + $0x578] sm:$0xff]  }
  0x97   :  { %2508 = vmatprep.subr.bf16.mxu1 %v2708_v37  ;;  %1972 = vmatprep.mubr.bf16.mxu0 %v70_v2  ;;  %v2764_v37 = vld [vmem:[#allocation2 + $0x5f8] sm:$0xff]  }
  0x98   :  { %2012 = vmatprep.mubr.bf16.mxu1 %v72_v3 }
  0x99   :  { %2487 = vmatpush3.bf16.msra.mxu0 %v2709_v38  ;;  %v2765_v38 = vld [vmem:[#allocation2 + $0x538] sm:$0xff]  }
  0x9a   :  { %2509 = vmatpush3.bf16.msra.mxu1 %v2710_v39  ;;  %2488 = vmatprep.subr.bf16.mxu0 %v2711_v40  ;;  %v2766_v39 = vld [vmem:[#allocation2 + $0x5b8] sm:$0xff]   ;;  %v50_v40 = vld [vmem:[%s2908_s0 + $0xa8] sm:$0xff] }
  0x9b   :  { %2510 = vmatprep.subr.bf16.mxu1 %v2712_v41  ;;  %v74_v41 = vpack.c.bf16 %v50_v40, %v50_v40 }
  0x9d   :  { %2489 = vmatpush3.bf16.msra.mxu0 %v2713_v42  ;;  %v52_v42 = vld [vmem:[%s2908_s0 + $0xb8] sm:$0xff] }
  0x9e   :  { %2511 = vmatpush3.bf16.msra.mxu1 %v2714_v43  ;;  %2490 = vmatprep.subr.bf16.mxu0 %v2715_v44  ;;  %v49_v43 = vld [vmem:[%s2908_s0 + $0xa0] sm:$0xff]  ;;  %v51_v44 = vld [vmem:[%s2908_s0 + $0xb0] sm:$0xff] }
  0x9f   :  { %2512 = vmatprep.subr.bf16.mxu1 %v2716_v45  ;;  %v76_v45 = vpack.c.bf16 %v52_v42, %v52_v42 }
  0xa1   :  { %2491 = vmatpush3.bf16.msra.mxu0 %v2717_v46  ;;  %v73_v46 = vpack.c.bf16 %v49_v43, %v49_v43 }
  0xa2   :  { %2513 = vmatpush3.bf16.msra.mxu1 %v2718_v47  ;;  %2492 = vmatprep.subr.bf16.mxu0 %v2719_v48  ;;  %v75_v47 = vpack.c.bf16 %v51_v44, %v51_v44 }
  0xa3   :  { %2514 = vmatprep.subr.bf16.mxu1 %v2720_v49 }
  0xa5   :  { %2493 = vmatpush3.bf16.msra.mxu0 %v2721_v50  ;;  %v2115_v50 = vld [vmem:[%s2910_s2] ss:$0 sm:$0xff] }
  0xa6   :  { %2515 = vmatpush3.bf16.msra.mxu1 %v2722_v51  ;;  %2494 = vmatprep.subr.bf16.mxu0 %v2723_v52 }
  0xa7   :  { %2516 = vmatprep.subr.bf16.mxu1 %v2724_v53 }
  0xa9   :  { %2495 = vmatpush3.bf16.msra.mxu0 %v2725_v54 }
  0xaa   :  { %2517 = vmatpush3.bf16.msra.mxu1 %v2726_v55  ;;  %2496 = vmatprep.subr.bf16.mxu0 %v2727_v56 }
  0xab   :  { %2518 = vmatprep.subr.bf16.mxu1 %v2728_v57 }
  0xad   :  { %2497 = vmatpush3.bf16.msra.mxu0 %v2729_v58 }
  0xae   :  { %2519 = vmatpush3.bf16.msra.mxu1 %v2730_v59  ;;  %2498 = vmatprep.subr.bf16.mxu0 %v2731_v60 }
  0xaf   :  { %2520 = vmatprep.subr.bf16.mxu1 %v2732_v61 }
  0xb1   :  { %2499 = vmatpush3.bf16.msra.mxu0 %v2733_v62 }
  0xb2   :  { %2521 = vmatpush3.bf16.msra.mxu1 %v2734_v63  ;;  %2528 = vmatprep.subr.bf16.mxu0 %v2735_v8 }
  0xb3   :  { %2550 = vmatprep.subr.bf16.mxu1 %v2736_v9 }
  0xb4   :  { %1973 = vmatmul.mubr.bf16.vlgmr.msra.gmra.mrb[16].mxu0 %v69_v6 }
  0xb5   :  { %2013 = vmatmul.mubr.bf16.vlgmr.msra.gmra.mrb[16].mxu1 %v71_v7  ;;  %2529 = vmatpush3.bf16.msra.mxu0 %v2737_v10 }
  0xb6   :  { %2551 = vmatpush3.bf16.msra.mxu1 %v2738_v11  ;;  %2530 = vmatprep.subr.bf16.mxu0 %v2739_v12 }
  0xb7   :  { %2552 = vmatprep.subr.bf16.mxu1 %v2740_v13  ;;  %2052 = vmatprep.mubr.bf16.mxu0 %v74_v41 }
  0xb8   :  { %2092 = vmatprep.mubr.bf16.mxu1 %v76_v45 }
  0xb9   :  { %2531 = vmatpush3.bf16.msra.mxu0 %v2741_v14 }
  0xba   :  { %2553 = vmatpush3.bf16.msra.mxu1 %v2742_v15  ;;  %2532 = vmatprep.subr.bf16.mxu0 %v2743_v16 }
  0xbb   :  { %2554 = vmatprep.subr.bf16.mxu1 %v2744_v17 }
  0xbd   :  { %2533 = vmatpush3.bf16.msra.mxu0 %v2745_v18 }
  0xbe   :  { %2555 = vmatpush3.bf16.msra.mxu1 %v2746_v19  ;;  %2534 = vmatprep.subr.bf16.mxu0 %v2747_v20 }
  0xbf   :  { %2556 = vmatprep.subr.bf16.mxu1 %v2748_v21 }
  0xc1   :  { %2535 = vmatpush3.bf16.msra.mxu0 %v2749_v22 }
  0xc2   :  { %2557 = vmatpush3.bf16.msra.mxu1 %v2750_v23  ;;  %2536 = vmatprep.subr.bf16.mxu0 %v2751_v24 }
  0xc3   :  { %2558 = vmatprep.subr.bf16.mxu1 %v2752_v25 }
  0xc5   :  { %2537 = vmatpush3.bf16.msra.mxu0 %v2753_v26 }
  0xc6   :  { %2559 = vmatpush3.bf16.msra.mxu1 %v2754_v27  ;;  %2538 = vmatprep.subr.bf16.mxu0 %v2755_v28 }
  0xc7   :  { %2560 = vmatprep.subr.bf16.mxu1 %v2756_v29 }
  0xc9   :  { %2539 = vmatpush3.bf16.msra.mxu0 %v2757_v30 }
  0xca   :  { %2561 = vmatpush3.bf16.msra.mxu1 %v2758_v31  ;;  %2540 = vmatprep.subr.bf16.mxu0 %v2759_v32 }
  0xcb   :  { %2562 = vmatprep.subr.bf16.mxu1 %v2760_v33 }
  0xcd   :  { %2541 = vmatpush3.bf16.msra.mxu0 %v2761_v34 }
  0xce   :  { %2563 = vmatpush3.bf16.msra.mxu1 %v2762_v35  ;;  %2542 = vmatprep.subr.bf16.mxu0 %v2763_v36 }
  0xcf   :  { %2564 = vmatprep.subr.bf16.mxu1 %v2764_v37 }
  0xd1   :  { %2543 = vmatpush3.bf16.msra.mxu0 %v2765_v38 }
  0xd2   :  { %2565 = vmatpush3.bf16.msra.mxu1 %v2766_v39 }
  0xd4   :  { %2053 = vmatmul.mubr.bf16.vlgmr.msra.gmra.mrb[20].mxu0 %v73_v46 }
  0xd5   :  { %2093 = vmatmul.mubr.bf16.vlgmr.msra.gmra.mrb[20].mxu1 %v75_v47 }
 0x107   :  { %v2324_v48 = vpop.f32.mrb[0].mxu0 }
 0x108   :  { %v2346_v49 = vpop.f32.mrb[0].mxu1  ;;  %v2325_v51 = vpop.f32.mrb[1].mxu0 }
 0x109   :  { %v2347_v52 = vpop.f32.mrb[1].mxu1  ;;  %v2326_v53 = vadd.f32 %v2325_v51, %v2324_v48  ;;  %v2327_v55 = vpop.f32.mrb[2].mxu0 }
 0x10a   :  { %v2348_v54 = vadd.f32 %v2347_v52, %v2346_v49  ;;  %v2349_v56 = vpop.f32.mrb[2].mxu1  ;;  %v2328_v57 = vpop.f32.mrb[3].mxu0 }
 0x10b   :  { %v2350_v58 = vpop.f32.mrb[3].mxu1  ;;  %v1655_v59 = vadd.f32 %v2326_v53, %v2115_v50 }
 0x10d   :  { %v1695_v60 = vadd.f32 %v2348_v54, %v1655_v59 }
 0x127   :  { %v2368_v61 = vpop.f32.mrb[4].mxu0 }
 0x128   :  { %v2390_v62 = vpop.f32.mrb[4].mxu1  ;;  %v2369_v63 = vpop.f32.mrb[5].mxu0 }
 0x129   :  { %v2370_v0 = vadd.f32 %v2369_v63, %v2368_v61  ;;  %v2391_v1 = vpop.f32.mrb[5].mxu1  ;;  %v2371_v2 = vpop.f32.mrb[6].mxu0 }
 0x12a   :  { %v2392_v3 = vadd.f32 %v2391_v1, %v2390_v62  ;;  %v2393_v4 = vpop.f32.mrb[6].mxu1  ;;  %v2372_v5 = vpop.f32.mrb[7].mxu0 }
 0x12b   :  { %v1735_v6 = vadd.f32 %v2370_v0, %v1695_v60  ;;  %v2394_v7 = vpop.f32.mrb[7].mxu1 }
 0x12d   :  { %v1775_v8 = vadd.f32 %v2392_v3, %v1735_v6 }
 0x147   :  { %v2412_v9 = vpop.f32.mrb[8].mxu0 }
 0x148   :  { %v2434_v10 = vpop.f32.mrb[8].mxu1  ;;  %v2413_v11 = vpop.f32.mrb[9].mxu0 }
 0x149   :  { %v2414_v12 = vadd.f32 %v2413_v11, %v2412_v9  ;;  %v2435_v13 = vpop.f32.mrb[9].mxu1  ;;  %v2415_v14 = vpop.f32.mrb[10].mxu0 }
 0x14a   :  { %v2436_v15 = vadd.f32 %v2435_v13, %v2434_v10  ;;  %v2437_v16 = vpop.f32.mrb[10].mxu1  ;;  %v2416_v17 = vpop.f32.mrb[11].mxu0 }
 0x14b   :  { %v1815_v18 = vadd.f32 %v2414_v12, %v1775_v8  ;;  %v2438_v19 = vpop.f32.mrb[11].mxu1 }
 0x14d   :  { %v1855_v20 = vadd.f32 %v2436_v15, %v1815_v18 }
 0x167   :  { %v2456_v21 = vpop.f32.mrb[12].mxu0 }
 0x168   :  { %v2478_v22 = vpop.f32.mrb[12].mxu1  ;;  %v2457_v23 = vpop.f32.mrb[13].mxu0 }
 0x169   :  { %v2479_v24 = vpop.f32.mrb[13].mxu1  ;;  %v2458_v25 = vadd.f32 %v2457_v23, %v2456_v21  ;;  %v2459_v27 = vpop.f32.mrb[14].mxu0 }
 0x16a   :  { %v2480_v26 = vadd.f32 %v2479_v24, %v2478_v22  ;;  %v2481_v28 = vpop.f32.mrb[14].mxu1  ;;  %v2460_v29 = vpop.f32.mrb[15].mxu0 }
 0x16b   :  { %v2482_v30 = vpop.f32.mrb[15].mxu1  ;;  %v1895_v31 = vadd.f32 %v2458_v25, %v1855_v20 }
 0x16d   :  { %v1935_v32 = vadd.f32 %v2480_v26, %v1895_v31 }
 0x187   :  { %v2500_v33 = vpop.f32.mrb[16].mxu0 }
 0x188   :  { %v2522_v34 = vpop.f32.mrb[16].mxu1  ;;  %v2501_v35 = vpop.f32.mrb[17].mxu0 }
 0x189   :  { %v2502_v36 = vadd.f32 %v2501_v35, %v2500_v33  ;;  %v2523_v37 = vpop.f32.mrb[17].mxu1  ;;  %v2503_v38 = vpop.f32.mrb[18].mxu0 }
 0x18a   :  { %v2524_v39 = vadd.f32 %v2523_v37, %v2522_v34  ;;  %v2525_v40 = vpop.f32.mrb[18].mxu1  ;;  %v2504_v41 = vpop.f32.mrb[19].mxu0 }
 0x18b   :  { %v1975_v42 = vadd.f32 %v2502_v36, %v1935_v32  ;;  %v2526_v43 = vpop.f32.mrb[19].mxu1 }
 0x18d   :  { %v2015_v44 = vadd.f32 %v2524_v39, %v1975_v42 }
 0x1a7   :  { %v2544_v45 = vpop.f32.mrb[20].mxu0 }
 0x1a8   :  { %v2566_v46 = vpop.f32.mrb[20].mxu1  ;;  %v2545_v47 = vpop.f32.mrb[21].mxu0 }
 0x1a9   :  { %v2546_v48 = vadd.f32 %v2545_v47, %v2544_v45  ;;  %v2567_v49 = vpop.f32.mrb[21].mxu1  ;;  %v2547_v50 = vpop.f32.mrb[22].mxu0 }
 0x1aa   :  { %v2568_v51 = vadd.f32 %v2567_v49, %v2566_v46  ;;  %v2569_v52 = vpop.f32.mrb[22].mxu1  ;;  %v2548_v53 = vpop.f32.mrb[23].mxu0 }
 0x1ab   :  { %v2055_v54 = vadd.f32 %v2546_v48, %v2015_v44  ;;  %v2570_v55 = vpop.f32.mrb[23].mxu1 }
 0x1ad   :  { %v2095_v56 = vadd.f32 %v2568_v51, %v2055_v54 }
 0x1af   :  { %2100 = vmax.xlane.f32.xlu0 %v2095_v56 }
 0x23c   :  { %v2101_v57 = vpop.xlane.xlu0 %2100 }
 0x23d   :  { %v2102_v58 = vsub.f32 %v2095_v56, %v2101_v57 }
 0x23f   :  { %v2103_v59 = vmul.f32 1.442695, %v2102_v58 }
 0x241   :  { %2767 = vpow2.f32 %v2103_v59 }
 0x24b   :  { %v2768_v60 = vpop.eup %2767 }
 0x24c   :  { %2105 = vadd.xlane.f32.xlu0 %v2768_v60 }
 0x2d9   :  { %v2106_v61 = vpop.xlane.xlu0 %2105 }
 0x2da   :  { %2769 = vrcp.f32 %v2106_v61 }
 0x2e4   :  { %v2770_v62 = vpop.eup %2769 }
 0x2e5   :  { %v2108_v63 = vmul.f32 %v2770_v62, %v2768_v60 }
 0x2e7   :  { %2109 = vst [vmem:[%s2911_s3] sm:$0xff] %v2108_v63 }
 0x2e8   :  { %2114 = vsyncpa [#allocation3], 1 }

</bundles_post_ra>
